<compile_context>
chip_gen: v7x
topology: tpu7x:2x2x1
jax: 0.10.0
libtpu: 0.0.40
codegen_flags: <defaults>
</compile_context>

<pallas_src>
import functools

import jax
import jax.numpy as jnp
from jax.experimental import pallas as pl
from jax.experimental.pallas import tpu as pltpu

INPUT_DIM = 32
NUM_EXPERTS = 8
HIDDEN_DIM = max(INPUT_DIM, 128)          # FinancialDenseGate hidden_dim -> 128
ENC_HIDDEN = 64                           # MarketConditionEncoder hidden_dim
ENC_GROUP = ENC_HIDDEN // 4               # 16 features per encoder branch
RC_HIDDEN = 32                            # regime classifier hidden
N_REGIMES = 4
N_REGIMES_PAD = 8                         # regime lanes padded 4 -> 8 (exact zeros)
LN_EPS = 1e-5
MAX_TILE_B = 1024                         # rows per grid step
_GELU_C = 0.7978845608028654              # sqrt(2/pi)


# ----------------------------- in-kernel math helpers -----------------------------

def _softmax_exact(x):
    m = jnp.max(x, axis=-1, keepdims=True)
    e = jnp.exp(x - m)
    return e / jnp.sum(e, axis=-1, keepdims=True)     # exact divide: rows sum to 1


def _layernorm(x, gamma, beta):
    mu = jnp.mean(x, axis=-1, keepdims=True)
    xc = x - mu
    var = jnp.mean(xc * xc, axis=-1, keepdims=True)
    return xc * jax.lax.rsqrt(var + LN_EPS) * gamma + beta


def _ln_gelu(z, gamma, beta, cdt):
    # LayerNorm stats in f32; gamma/beta apply + GELU polynomial in `cdt`
    # (bf16 on v6e/v7x where the VPU has a bf16 path, f32 on v5e).
    mu = jnp.mean(z, axis=-1, keepdims=True)
    zc = z - mu
    var = jnp.mean(zc * zc, axis=-1, keepdims=True)
    y = (zc * jax.lax.rsqrt(var + LN_EPS)).astype(cdt)
    y = y * gamma.astype(cdt) + beta.astype(cdt)
    y2 = y * y
    inner = (_GELU_C * y) * (1.0 + 0.044715 * y2)      # reassociated: 1 fewer vmul/elem
    return (0.5 * y) * (1.0 + jnp.tanh(inner))         # tanh -> EUP slot


# ----------------------------------- kernel ---------------------------------------

def gate_kernel(x_ref,
                enc_w_ref, enc_b_ref, enc_g_ref, enc_bb_ref,     # fused market encoder
                rc_w1_ref, rc_b1_ref, rc_w2_ref, rc_b2_ref,      # regime classifier (N padded to 8)
                gw1x_ref, gw1m_ref, gw1p_ref, gb1_ref,           # gating layer 1, split K
                ln1g_ref, ln1b_ref,
                gw2_ref, gb2_ref, ln2g_ref, ln2b_ref,            # gating layer 2
                gw3_ref, gb3_ref, aff_ref,                       # final proj + regime affinity
                temp_ref,                                        # temperature (SMEM scalar)
                out_ref,
                *, compute_dtype):
    bf16 = jnp.bfloat16

    xb = x_ref[...].astype(bf16)                                 # [TB, 32]

    # --- MarketConditionEncoder: 4 branches fused into one [TB,32]@[32,64] matmul ---
    h = jnp.dot(xb, enc_w_ref[...], preferred_element_type=jnp.float32) + enc_b_ref[...]
    h = jnp.maximum(h, 0.0)
    # per-branch LayerNorm over its 16 lanes; results stay in vregs (no VMEM round trip)
    parts = []
    for g in range(4):
        sl = slice(g * ENC_GROUP, (g + 1) * ENC_GROUP)
        parts.append(_layernorm(h[:, sl], enc_g_ref[:, sl], enc_bb_ref[:, sl]))
    mf_b = jnp.concatenate(parts, axis=-1).astype(bf16)          # [TB, 64] market_features

    # --- regime classifier: [TB,64]@[64,32], ReLU, [TB,32]@[32,8], softmax ---
    rc_h = jnp.dot(mf_b, rc_w1_ref[...], preferred_element_type=jnp.float32) + rc_b1_ref[...]
    rc_h = jnp.maximum(rc_h, 0.0)
    r_logits = (jnp.dot(rc_h.astype(bf16), rc_w2_ref[...],
                        preferred_element_type=jnp.float32) + rc_b2_ref[...])
    # lanes 4:8 carry bias -1e30 -> exp underflows to exactly 0 after softmax
    regime_probs = _softmax_exact(r_logits)                      # [TB, 8] f32, lanes 4:8 == 0
    probs_b = regime_probs.astype(bf16)

    # --- gating layer 1: three partial dots (x | mf | probs_pad), f32 accumulation ---
    z1 = (jnp.dot(xb, gw1x_ref[...], preferred_element_type=jnp.float32)
          + jnp.dot(mf_b, gw1m_ref[...], preferred_element_type=jnp.float32)
          + jnp.dot(probs_b, gw1p_ref[...], preferred_element_type=jnp.float32)
          + gb1_ref[...])
    h1 = _ln_gelu(z1, ln1g_ref[...], ln1b_ref[...], compute_dtype)   # [TB, H]

    # --- gating layer 2 ---
    z2 = jnp.dot(h1.astype(bf16), gw2_ref[...], preferred_element_type=jnp.float32) + gb2_ref[...]
    h2 = _ln_gelu(z2, ln2g_ref[...], ln2b_ref[...], compute_dtype)   # [TB, H]

    # --- final projection + regime-expert-affinity bias (pad rows of aff are zero) ---
    logits = jnp.dot(h2.astype(bf16), gw3_ref[...], preferred_element_type=jnp.float32) + gb3_ref[...]
    logits = logits + jnp.dot(probs_b, aff_ref[...], preferred_element_type=jnp.float32)

    # temperature-scaled softmax (exact divide so gate weights sum to 1)
    inv_t = 1.0 / jnp.clip(temp_ref[0], 0.1, 5.0)
    out_ref[...] = _softmax_exact(logits * inv_t)                # [TB, E]


# ----------------------------------- wrapper ---------------------------------------

def _round_up(n, m):
    return ((n + m - 1) // m) * m


def _elementwise_dtype():
    # bf16 elementwise only where the VPU has a bf16 path (v6e / v7x); f32 is the
    # safe default (v5e has no bf16 VPU and would emulate it).
    try:
        kind = jax.devices()[0].device_kind.lower()
    except Exception:
        return jnp.float32
    if ("v6" in kind) or ("v7" in kind) or ("trillium" in kind):
        return jnp.bfloat16
    return jnp.float32


def gate_forward(x, params):
    B = x.shape[0]
    TB = _round_up(min(B, MAX_TILE_B), 8)
    # Give v7x's second TensorCore work when one tile would otherwise cover the batch.
    if B >= 64 and _round_up(B, TB) // TB < 2:
        TB = _round_up(pl.cdiv(B, 2), 8)
    Bp = _round_up(B, TB)
    if Bp != B:
        x = jnp.pad(x, ((0, Bp - B), (0, 0)))                    # zero rows; sliced off below

    weights, temp = params[:-1], params[-1]

    in_specs = (
        [pl.BlockSpec((TB, INPUT_DIM), lambda i: (i, 0))]                    # x: tiled over batch
        + [pl.BlockSpec(w.shape, lambda i, n=len(w.shape): (0,) * n)         # weights: VMEM-resident
           for w in weights]
        + [pl.BlockSpec(memory_space=pltpu.MemorySpace.SMEM)]                # temperature scalar
    )

    kernel = functools.partial(gate_kernel, compute_dtype=_elementwise_dtype())

    out = pl.pallas_call(
        kernel,
        out_shape=jax.ShapeDtypeStruct((Bp, NUM_EXPERTS), jnp.float32),
        grid=(Bp // TB,),
        in_specs=in_specs,
        out_specs=pl.BlockSpec((TB, NUM_EXPERTS), lambda i: (i, 0)),
        compiler_params=pltpu.CompilerParams(dimension_semantics=("parallel",)),
    )(x, *weights, temp)
    return out[:B]


# ------------------------------ deterministic params -------------------------------

def _lin_w(key, fan_in, shape):
    # mimic PyTorch Linear default init: U(-1/sqrt(fan_in), 1/sqrt(fan_in))
    bound = 1.0 / (fan_in ** 0.5)
    return jax.random.uniform(key, shape, jnp.float32, -bound, bound)


def init_params(key):
    ks = jax.random.split(key, 13)
    D, H, E = INPUT_DIM, HIDDEN_DIM, NUM_EXPERTS
    TOTAL_IN = D + ENC_HIDDEN + N_REGIMES       # 100
    bf = lambda a: a.astype(jnp.bfloat16)

    # MarketConditionEncoder: 4x (Linear(D,16) -> ReLU -> LayerNorm(16)), fused on the out dim
    enc_w = _lin_w(ks[0], D, (D, ENC_HIDDEN))
    enc_b = _lin_w(ks[1], D, (1, ENC_HIDDEN))
    enc_g = jnp.ones((1, ENC_HIDDEN), jnp.float32)
    enc_bb = jnp.zeros((1, ENC_HIDDEN), jnp.float32)

    # regime classifier: Linear(64,32) -> ReLU -> (Dropout id) -> Linear(32,4)
    rc_w1 = _lin_w(ks[2], ENC_HIDDEN, (ENC_HIDDEN, RC_HIDDEN))
    rc_b1 = _lin_w(ks[3], ENC_HIDDEN, (1, RC_HIDDEN))
    rc_w2 = _lin_w(ks[4], RC_HIDDEN, (RC_HIDDEN, N_REGIMES))
    rc_b2 = _lin_w(ks[5], RC_HIDDEN, (1, N_REGIMES))
    # pad output lanes 4->8: zero weight columns + -1e30 bias => softmax pads are exactly 0
    rc_w2 = jnp.pad(rc_w2, ((0, 0), (0, N_REGIMES_PAD - N_REGIMES)))
    rc_b2 = jnp.concatenate(
        [rc_b2, jnp.full((1, N_REGIMES_PAD - N_REGIMES), -1e30, jnp.float32)], axis=1)

    # gating layer 1: Linear(100, H), split along K into [x | market_features | probs_pad]
    gw1 = _lin_w(ks[6], TOTAL_IN, (TOTAL_IN, H))
    gw1x = gw1[:D]                                               # [32,  H]
    gw1m = gw1[D:D + ENC_HIDDEN]                                 # [64,  H]
    gw1p = jnp.pad(gw1[D + ENC_HIDDEN:], ((0, N_REGIMES_PAD - N_REGIMES), (0, 0)))  # [8, H]
    gb1 = _lin_w(ks[7], TOTAL_IN, (1, H))
    ln1g = jnp.ones((1, H), jnp.float32)
    ln1b = jnp.zeros((1, H), jnp.float32)

    gw2 = _lin_w(ks[8], H, (H, H))
    gb2 = _lin_w(ks[9], H, (1, H))
    ln2g = jnp.ones((1, H), jnp.float32)
    ln2b = jnp.zeros((1, H), jnp.float32)

    gw3 = _lin_w(ks[10], H, (H, E))
    gb3 = _lin_w(ks[11], H, (1, E))

    aff = jax.random.normal(ks[12], (N_REGIMES, E), jnp.float32) * 0.1   # regime_expert_affinity
    aff = jnp.pad(aff, ((0, N_REGIMES_PAD - N_REGIMES), (0, 0)))         # pad rows are zero (exact)
    temp = jnp.ones((1,), jnp.float32)                                   # temperature parameter

    # MXU operands in bf16 (f32 accumulation); biases / LN params stay f32.
    return (bf(enc_w), enc_b, enc_g, enc_bb,
            bf(rc_w1), rc_b1, bf(rc_w2), rc_b2,
            bf(gw1x), bf(gw1m), bf(gw1p), gb1, ln1g, ln1b,
            bf(gw2), gb2, ln2g, ln2b,
            bf(gw3), gb3, bf(aff), temp)


if __name__ == "__main__":
    key = jax.random.PRNGKey(0)
    pkey, xkey = jax.random.split(key)
    params = init_params(pkey)

    B = 2
    x = jax.random.normal(xkey, (B, INPUT_DIM), jnp.float32)

    weights = gate_forward(x, params)
    weights = jax.block_until_ready(weights)

    assert weights.shape == (B, NUM_EXPERTS)
    assert bool(jnp.all(jnp.isfinite(weights)))
    row_sums = jnp.sum(weights, axis=-1)
    assert bool(jnp.all(jnp.abs(row_sums - 1.0) < 1e-3)), row_sums
    print("KERNEL_OK")
</pallas_src>

<mosaic_0001>
module attributes {stable_mosaic.version = 11 : i64} {
  func.func @gate_kernel(%arg0: i32, %arg1: memref<8x32xf32, #tpu.memory_space<vmem>>, %arg2: memref<32x64xbf16, #tpu.memory_space<vmem>>, %arg3: memref<1x64xf32, #tpu.memory_space<vmem>>, %arg4: memref<1x64xf32, #tpu.memory_space<vmem>>, %arg5: memref<1x64xf32, #tpu.memory_space<vmem>>, %arg6: memref<64x32xbf16, #tpu.memory_space<vmem>>, %arg7: memref<1x32xf32, #tpu.memory_space<vmem>>, %arg8: memref<32x8xbf16, #tpu.memory_space<vmem>>, %arg9: memref<1x8xf32, #tpu.memory_space<vmem>>, %arg10: memref<32x128xbf16, #tpu.memory_space<vmem>>, %arg11: memref<64x128xbf16, #tpu.memory_space<vmem>>, %arg12: memref<8x128xbf16, #tpu.memory_space<vmem>>, %arg13: memref<1x128xf32, #tpu.memory_space<vmem>>, %arg14: memref<1x128xf32, #tpu.memory_space<vmem>>, %arg15: memref<1x128xf32, #tpu.memory_space<vmem>>, %arg16: memref<128x128xbf16, #tpu.memory_space<vmem>>, %arg17: memref<1x128xf32, #tpu.memory_space<vmem>>, %arg18: memref<1x128xf32, #tpu.memory_space<vmem>>, %arg19: memref<1x128xf32, #tpu.memory_space<vmem>>, %arg20: memref<128x8xbf16, #tpu.memory_space<vmem>>, %arg21: memref<1x8xf32, #tpu.memory_space<vmem>>, %arg22: memref<8x8xbf16, #tpu.memory_space<vmem>>, %arg23: memref<1xf32, #tpu.memory_space<smem>>, %arg24: memref<8x8xf32, #tpu.memory_space<vmem>>) attributes {dimension_semantics = [#tpu.dimension_semantics<parallel>], iteration_bounds = array<i64: 1>, scalar_prefetch = 0 : i64, scratch_operands = 0 : i64, tpu.core_type = #tpu.core_type<tc>, window_params = [{transform_indices = @transform_0, window_bounds = array<i64: 8, 32>}, {pipeline_mode = #tpu.pipeline_mode<synchronous>, transform_indices = @transform_1, window_bounds = array<i64: 32, 64>}, {pipeline_mode = #tpu.pipeline_mode<synchronous>, transform_indices = @transform_2, window_bounds = array<i64: 1, 64>}, {pipeline_mode = #tpu.pipeline_mode<synchronous>, transform_indices = @transform_3, window_bounds = array<i64: 1, 64>}, {pipeline_mode = #tpu.pipeline_mode<synchronous>, transform_indices = @transform_4, window_bounds = array<i64: 1, 64>}, {pipeline_mode = #tpu.pipeline_mode<synchronous>, transform_indices = @transform_5, window_bounds = array<i64: 64, 32>}, {pipeline_mode = #tpu.pipeline_mode<synchronous>, transform_indices = @transform_6, window_bounds = array<i64: 1, 32>}, {pipeline_mode = #tpu.pipeline_mode<synchronous>, transform_indices = @transform_7, window_bounds = array<i64: 32, 8>}, {pipeline_mode = #tpu.pipeline_mode<synchronous>, transform_indices = @transform_8, window_bounds = array<i64: 1, 8>}, {pipeline_mode = #tpu.pipeline_mode<synchronous>, transform_indices = @transform_9, window_bounds = array<i64: 32, 128>}, {pipeline_mode = #tpu.pipeline_mode<synchronous>, transform_indices = @transform_10, window_bounds = array<i64: 64, 128>}, {pipeline_mode = #tpu.pipeline_mode<synchronous>, transform_indices = @transform_11, window_bounds = array<i64: 8, 128>}, {pipeline_mode = #tpu.pipeline_mode<synchronous>, transform_indices = @transform_12, window_bounds = array<i64: 1, 128>}, {pipeline_mode = #tpu.pipeline_mode<synchronous>, transform_indices = @transform_13, window_bounds = array<i64: 1, 128>}, {pipeline_mode = #tpu.pipeline_mode<synchronous>, transform_indices = @transform_14, window_bounds = array<i64: 1, 128>}, {pipeline_mode = #tpu.pipeline_mode<synchronous>, transform_indices = @transform_15, window_bounds = array<i64: 128, 128>}, {pipeline_mode = #tpu.pipeline_mode<synchronous>, transform_indices = @transform_16, window_bounds = array<i64: 1, 128>}, {pipeline_mode = #tpu.pipeline_mode<synchronous>, transform_indices = @transform_17, window_bounds = array<i64: 1, 128>}, {pipeline_mode = #tpu.pipeline_mode<synchronous>, transform_indices = @transform_18, window_bounds = array<i64: 1, 128>}, {pipeline_mode = #tpu.pipeline_mode<synchronous>, transform_indices = @transform_19, window_bounds = array<i64: 128, 8>}, {pipeline_mode = #tpu.pipeline_mode<synchronous>, transform_indices = @transform_20, window_bounds = array<i64: 1, 8>}, {pipeline_mode = #tpu.pipeline_mode<synchronous>, transform_indices = @transform_21, window_bounds = array<i64: 8, 8>}, {transform_indices = @transform_22, window_bounds = array<i64: 1>}, {transform_indices = @transform_23, window_bounds = array<i64: 8, 8>}]} {
    %c0 = arith.constant 0 : index
    %c0_0 = arith.constant 0 : index
    %0 = vector.load %arg1[%c0, %c0_0] : memref<8x32xf32, #tpu.memory_space<vmem>>, vector<8x32xf32>
    %1 = arith.truncf %0 : vector<8x32xf32> to vector<8x32xbf16>
    %c0_1 = arith.constant 0 : index
    %c0_2 = arith.constant 0 : index
    %2 = vector.load %arg2[%c0_1, %c0_2] : memref<32x64xbf16, #tpu.memory_space<vmem>>, vector<32x64xbf16>
    %cst = arith.constant dense<0.000000e+00> : vector<8x64xf32>
    %3 = tpu.matmul %1, %2, %cst {dimension_numbers = #tpu.dot_dimension_numbers<[1], [0], [0], [1], [0, 0, 1, 1], [], []>} : vector<8x32xbf16>, vector<32x64xbf16>, vector<8x64xf32> -> vector<8x64xf32>
    %c0_3 = arith.constant 0 : index
    %c0_4 = arith.constant 0 : index
    %4 = vector.load %arg3[%c0_3, %c0_4] : memref<1x64xf32, #tpu.memory_space<vmem>>, vector<1x64xf32>
    %5 = vector.broadcast %4 : vector<1x64xf32> to vector<8x64xf32>
    %6 = arith.addf %3, %5 : vector<8x64xf32>
    %cst_5 = arith.constant 0.000000e+00 : f32
    %7 = vector.broadcast %cst_5 : f32 to vector<8x64xf32>
    %8 = arith.maximumf %6, %7 : vector<8x64xf32>
    %9 = vector.extract_strided_slice %8 {offsets = [0, 0], sizes = [8, 16], strides = [1, 1]} : vector<8x64xf32> to vector<8x16xf32>
    %c0_6 = arith.constant 0 : index
    %c0_7 = arith.constant 0 : index
    %10 = vector.load %arg4[%c0_6, %c0_7] : memref<1x64xf32, #tpu.memory_space<vmem>>, vector<1x16xf32>
    %c0_8 = arith.constant 0 : index
    %c0_9 = arith.constant 0 : index
    %11 = vector.load %arg5[%c0_8, %c0_9] : memref<1x64xf32, #tpu.memory_space<vmem>>, vector<1x16xf32>
    %cst_10 = arith.constant dense<0.000000e+00> : vector<8xf32>
    %12 = vector.multi_reduction <add>, %9, %cst_10 [1] : vector<8x16xf32> to vector<8xf32>
    %13 = vector.shape_cast %12 : vector<8xf32> to vector<8x1xf32>
    %cst_11 = arith.constant 1.600000e+01 : f32
    %14 = vector.broadcast %cst_11 : f32 to vector<8x1xf32>
    %15 = arith.divf %13, %14 : vector<8x1xf32>
    %16 = vector.broadcast %15 : vector<8x1xf32> to vector<8x16xf32>
    %17 = arith.subf %9, %16 : vector<8x16xf32>
    %18 = arith.mulf %17, %17 : vector<8x16xf32>
    %cst_12 = arith.constant dense<0.000000e+00> : vector<8xf32>
    %19 = vector.multi_reduction <add>, %18, %cst_12 [1] : vector<8x16xf32> to vector<8xf32>
    %20 = vector.shape_cast %19 : vector<8xf32> to vector<8x1xf32>
    %cst_13 = arith.constant 1.600000e+01 : f32
    %21 = vector.broadcast %cst_13 : f32 to vector<8x1xf32>
    %22 = arith.divf %20, %21 : vector<8x1xf32>
    %cst_14 = arith.constant 9.99999974E-6 : f32
    %23 = vector.broadcast %cst_14 : f32 to vector<8x1xf32>
    %24 = arith.addf %22, %23 : vector<8x1xf32>
    %25 = math.rsqrt %24 : vector<8x1xf32>
    %26 = vector.broadcast %25 : vector<8x1xf32> to vector<8x16xf32>
    %27 = arith.mulf %17, %26 : vector<8x16xf32>
    %28 = vector.broadcast %10 : vector<1x16xf32> to vector<8x16xf32>
    %29 = arith.mulf %27, %28 : vector<8x16xf32>
    %30 = vector.broadcast %11 : vector<1x16xf32> to vector<8x16xf32>
    %31 = arith.addf %29, %30 : vector<8x16xf32>
    %32 = vector.extract_strided_slice %8 {offsets = [0, 16], sizes = [8, 16], strides = [1, 1]} : vector<8x64xf32> to vector<8x16xf32>
    %c0_15 = arith.constant 0 : index
    %c16 = arith.constant 16 : index
    %33 = vector.load %arg4[%c0_15, %c16] : memref<1x64xf32, #tpu.memory_space<vmem>>, vector<1x16xf32>
    %c0_16 = arith.constant 0 : index
    %c16_17 = arith.constant 16 : index
    %34 = vector.load %arg5[%c0_16, %c16_17] : memref<1x64xf32, #tpu.memory_space<vmem>>, vector<1x16xf32>
    %cst_18 = arith.constant dense<0.000000e+00> : vector<8xf32>
    %35 = vector.multi_reduction <add>, %32, %cst_18 [1] : vector<8x16xf32> to vector<8xf32>
    %36 = vector.shape_cast %35 : vector<8xf32> to vector<8x1xf32>
    %cst_19 = arith.constant 1.600000e+01 : f32
    %37 = vector.broadcast %cst_19 : f32 to vector<8x1xf32>
    %38 = arith.divf %36, %37 : vector<8x1xf32>
    %39 = vector.broadcast %38 : vector<8x1xf32> to vector<8x16xf32>
    %40 = arith.subf %32, %39 : vector<8x16xf32>
    %41 = arith.mulf %40, %40 : vector<8x16xf32>
    %cst_20 = arith.constant dense<0.000000e+00> : vector<8xf32>
    %42 = vector.multi_reduction <add>, %41, %cst_20 [1] : vector<8x16xf32> to vector<8xf32>
    %43 = vector.shape_cast %42 : vector<8xf32> to vector<8x1xf32>
    %cst_21 = arith.constant 1.600000e+01 : f32
    %44 = vector.broadcast %cst_21 : f32 to vector<8x1xf32>
    %45 = arith.divf %43, %44 : vector<8x1xf32>
    %cst_22 = arith.constant 9.99999974E-6 : f32
    %46 = vector.broadcast %cst_22 : f32 to vector<8x1xf32>
    %47 = arith.addf %45, %46 : vector<8x1xf32>
    %48 = math.rsqrt %47 : vector<8x1xf32>
    %49 = vector.broadcast %48 : vector<8x1xf32> to vector<8x16xf32>
    %50 = arith.mulf %40, %49 : vector<8x16xf32>
    %51 = vector.broadcast %33 : vector<1x16xf32> to vector<8x16xf32>
    %52 = arith.mulf %50, %51 : vector<8x16xf32>
    %53 = vector.broadcast %34 : vector<1x16xf32> to vector<8x16xf32>
    %54 = arith.addf %52, %53 : vector<8x16xf32>
    %55 = vector.extract_strided_slice %8 {offsets = [0, 32], sizes = [8, 16], strides = [1, 1]} : vector<8x64xf32> to vector<8x16xf32>
    %c0_23 = arith.constant 0 : index
    %c32 = arith.constant 32 : index
    %56 = vector.load %arg4[%c0_23, %c32] : memref<1x64xf32, #tpu.memory_space<vmem>>, vector<1x16xf32>
    %c0_24 = arith.constant 0 : index
    %c32_25 = arith.constant 32 : index
    %57 = vector.load %arg5[%c0_24, %c32_25] : memref<1x64xf32, #tpu.memory_space<vmem>>, vector<1x16xf32>
    %cst_26 = arith.constant dense<0.000000e+00> : vector<8xf32>
    %58 = vector.multi_reduction <add>, %55, %cst_26 [1] : vector<8x16xf32> to vector<8xf32>
    %59 = vector.shape_cast %58 : vector<8xf32> to vector<8x1xf32>
    %cst_27 = arith.constant 1.600000e+01 : f32
    %60 = vector.broadcast %cst_27 : f32 to vector<8x1xf32>
    %61 = arith.divf %59, %60 : vector<8x1xf32>
    %62 = vector.broadcast %61 : vector<8x1xf32> to vector<8x16xf32>
    %63 = arith.subf %55, %62 : vector<8x16xf32>
    %64 = arith.mulf %63, %63 : vector<8x16xf32>
    %cst_28 = arith.constant dense<0.000000e+00> : vector<8xf32>
    %65 = vector.multi_reduction <add>, %64, %cst_28 [1] : vector<8x16xf32> to vector<8xf32>
    %66 = vector.shape_cast %65 : vector<8xf32> to vector<8x1xf32>
    %cst_29 = arith.constant 1.600000e+01 : f32
    %67 = vector.broadcast %cst_29 : f32 to vector<8x1xf32>
    %68 = arith.divf %66, %67 : vector<8x1xf32>
    %cst_30 = arith.constant 9.99999974E-6 : f32
    %69 = vector.broadcast %cst_30 : f32 to vector<8x1xf32>
    %70 = arith.addf %68, %69 : vector<8x1xf32>
    %71 = math.rsqrt %70 : vector<8x1xf32>
    %72 = vector.broadcast %71 : vector<8x1xf32> to vector<8x16xf32>
    %73 = arith.mulf %63, %72 : vector<8x16xf32>
    %74 = vector.broadcast %56 : vector<1x16xf32> to vector<8x16xf32>
    %75 = arith.mulf %73, %74 : vector<8x16xf32>
    %76 = vector.broadcast %57 : vector<1x16xf32> to vector<8x16xf32>
    %77 = arith.addf %75, %76 : vector<8x16xf32>
    %78 = vector.extract_strided_slice %8 {offsets = [0, 48], sizes = [8, 16], strides = [1, 1]} : vector<8x64xf32> to vector<8x16xf32>
    %c0_31 = arith.constant 0 : index
    %c48 = arith.constant 48 : index
    %79 = vector.load %arg4[%c0_31, %c48] : memref<1x64xf32, #tpu.memory_space<vmem>>, vector<1x16xf32>
    %c0_32 = arith.constant 0 : index
    %c48_33 = arith.constant 48 : index
    %80 = vector.load %arg5[%c0_32, %c48_33] : memref<1x64xf32, #tpu.memory_space<vmem>>, vector<1x16xf32>
    %cst_34 = arith.constant dense<0.000000e+00> : vector<8xf32>
    %81 = vector.multi_reduction <add>, %78, %cst_34 [1] : vector<8x16xf32> to vector<8xf32>
    %82 = vector.shape_cast %81 : vector<8xf32> to vector<8x1xf32>
    %cst_35 = arith.constant 1.600000e+01 : f32
    %83 = vector.broadcast %cst_35 : f32 to vector<8x1xf32>
    %84 = arith.divf %82, %83 : vector<8x1xf32>
    %85 = vector.broadcast %84 : vector<8x1xf32> to vector<8x16xf32>
    %86 = arith.subf %78, %85 : vector<8x16xf32>
    %87 = arith.mulf %86, %86 : vector<8x16xf32>
    %cst_36 = arith.constant dense<0.000000e+00> : vector<8xf32>
    %88 = vector.multi_reduction <add>, %87, %cst_36 [1] : vector<8x16xf32> to vector<8xf32>
    %89 = vector.shape_cast %88 : vector<8xf32> to vector<8x1xf32>
    %cst_37 = arith.constant 1.600000e+01 : f32
    %90 = vector.broadcast %cst_37 : f32 to vector<8x1xf32>
    %91 = arith.divf %89, %90 : vector<8x1xf32>
    %cst_38 = arith.constant 9.99999974E-6 : f32
    %92 = vector.broadcast %cst_38 : f32 to vector<8x1xf32>
    %93 = arith.addf %91, %92 : vector<8x1xf32>
    %94 = math.rsqrt %93 : vector<8x1xf32>
    %95 = vector.broadcast %94 : vector<8x1xf32> to vector<8x16xf32>
    %96 = arith.mulf %86, %95 : vector<8x16xf32>
    %97 = vector.broadcast %79 : vector<1x16xf32> to vector<8x16xf32>
    %98 = arith.mulf %96, %97 : vector<8x16xf32>
    %99 = vector.broadcast %80 : vector<1x16xf32> to vector<8x16xf32>
    %100 = arith.addf %98, %99 : vector<8x16xf32>
    %101 = tpu.concatenate %31, %54, %77, %100 in 1 : vector<8x16xf32>, vector<8x16xf32>, vector<8x16xf32>, vector<8x16xf32> -> vector<8x64xf32>
    %102 = arith.truncf %101 : vector<8x64xf32> to vector<8x64xbf16>
    %c0_39 = arith.constant 0 : index
    %c0_40 = arith.constant 0 : index
    %103 = vector.load %arg6[%c0_39, %c0_40] : memref<64x32xbf16, #tpu.memory_space<vmem>>, vector<64x32xbf16>
    %cst_41 = arith.constant dense<0.000000e+00> : vector<8x32xf32>
    %104 = tpu.matmul %102, %103, %cst_41 {dimension_numbers = #tpu.dot_dimension_numbers<[1], [0], [0], [1], [0, 0, 1, 1], [], []>} : vector<8x64xbf16>, vector<64x32xbf16>, vector<8x32xf32> -> vector<8x32xf32>
    %c0_42 = arith.constant 0 : index
    %c0_43 = arith.constant 0 : index
    %105 = vector.load %arg7[%c0_42, %c0_43] : memref<1x32xf32, #tpu.memory_space<vmem>>, vector<1x32xf32>
    %106 = vector.broadcast %105 : vector<1x32xf32> to vector<8x32xf32>
    %107 = arith.addf %104, %106 : vector<8x32xf32>
    %cst_44 = arith.constant 0.000000e+00 : f32
    %108 = vector.broadcast %cst_44 : f32 to vector<8x32xf32>
    %109 = arith.maximumf %107, %108 : vector<8x32xf32>
    %110 = arith.truncf %109 : vector<8x32xf32> to vector<8x32xbf16>
    %c0_45 = arith.constant 0 : index
    %c0_46 = arith.constant 0 : index
    %111 = vector.load %arg8[%c0_45, %c0_46] : memref<32x8xbf16, #tpu.memory_space<vmem>>, vector<32x8xbf16>
    %cst_47 = arith.constant dense<0.000000e+00> : vector<8x8xf32>
    %112 = tpu.matmul %110, %111, %cst_47 {dimension_numbers = #tpu.dot_dimension_numbers<[1], [0], [0], [1], [0, 0, 1, 1], [], []>} : vector<8x32xbf16>, vector<32x8xbf16>, vector<8x8xf32> -> vector<8x8xf32>
    %c0_48 = arith.constant 0 : index
    %c0_49 = arith.constant 0 : index
    %113 = vector.load %arg9[%c0_48, %c0_49] : memref<1x8xf32, #tpu.memory_space<vmem>>, vector<1x8xf32>
    %114 = vector.broadcast %113 : vector<1x8xf32> to vector<8x8xf32>
    %115 = arith.addf %112, %114 : vector<8x8xf32>
    %cst_50 = arith.constant dense<0xFF800000> : vector<8xf32>
    %116 = vector.multi_reduction <maximumf>, %115, %cst_50 [1] : vector<8x8xf32> to vector<8xf32>
    %117 = vector.shape_cast %116 : vector<8xf32> to vector<8x1xf32>
    %118 = vector.broadcast %117 : vector<8x1xf32> to vector<8x8xf32>
    %119 = arith.subf %115, %118 : vector<8x8xf32>
    %120 = math.exp %119 : vector<8x8xf32>
    %cst_51 = arith.constant dense<0.000000e+00> : vector<8xf32>
    %121 = vector.multi_reduction <add>, %120, %cst_51 [1] : vector<8x8xf32> to vector<8xf32>
    %122 = vector.shape_cast %121 : vector<8xf32> to vector<8x1xf32>
    %123 = vector.broadcast %122 : vector<8x1xf32> to vector<8x8xf32>
    %124 = arith.divf %120, %123 : vector<8x8xf32>
    %125 = arith.truncf %124 : vector<8x8xf32> to vector<8x8xbf16>
    %c0_52 = arith.constant 0 : index
    %c0_53 = arith.constant 0 : index
    %126 = vector.load %arg10[%c0_52, %c0_53] : memref<32x128xbf16, #tpu.memory_space<vmem>>, vector<32x128xbf16>
    %cst_54 = arith.constant dense<0.000000e+00> : vector<8x128xf32>
    %127 = tpu.matmul %1, %126, %cst_54 {dimension_numbers = #tpu.dot_dimension_numbers<[1], [0], [0], [1], [0, 0, 1, 1], [], []>} : vector<8x32xbf16>, vector<32x128xbf16>, vector<8x128xf32> -> vector<8x128xf32>
    %c0_55 = arith.constant 0 : index
    %c0_56 = arith.constant 0 : index
    %128 = vector.load %arg11[%c0_55, %c0_56] : memref<64x128xbf16, #tpu.memory_space<vmem>>, vector<64x128xbf16>
    %cst_57 = arith.constant dense<0.000000e+00> : vector<8x128xf32>
    %129 = tpu.matmul %102, %128, %cst_57 {dimension_numbers = #tpu.dot_dimension_numbers<[1], [0], [0], [1], [0, 0, 1, 1], [], []>} : vector<8x64xbf16>, vector<64x128xbf16>, vector<8x128xf32> -> vector<8x128xf32>
    %130 = arith.addf %127, %129 : vector<8x128xf32>
    %c0_58 = arith.constant 0 : index
    %c0_59 = arith.constant 0 : index
    %131 = vector.load %arg12[%c0_58, %c0_59] : memref<8x128xbf16, #tpu.memory_space<vmem>>, vector<8x128xbf16>
    %cst_60 = arith.constant dense<0.000000e+00> : vector<8x128xf32>
    %132 = tpu.matmul %125, %131, %cst_60 {dimension_numbers = #tpu.dot_dimension_numbers<[1], [0], [0], [1], [0, 0, 1, 1], [], []>} : vector<8x8xbf16>, vector<8x128xbf16>, vector<8x128xf32> -> vector<8x128xf32>
    %133 = arith.addf %130, %132 : vector<8x128xf32>
    %c0_61 = arith.constant 0 : index
    %c0_62 = arith.constant 0 : index
    %134 = vector.load %arg13[%c0_61, %c0_62] : memref<1x128xf32, #tpu.memory_space<vmem>>, vector<1x128xf32>
    %135 = vector.broadcast %134 : vector<1x128xf32> to vector<8x128xf32>
    %136 = arith.addf %133, %135 : vector<8x128xf32>
    %c0_63 = arith.constant 0 : index
    %c0_64 = arith.constant 0 : index
    %137 = vector.load %arg14[%c0_63, %c0_64] : memref<1x128xf32, #tpu.memory_space<vmem>>, vector<1x128xf32>
    %c0_65 = arith.constant 0 : index
    %c0_66 = arith.constant 0 : index
    %138 = vector.load %arg15[%c0_65, %c0_66] : memref<1x128xf32, #tpu.memory_space<vmem>>, vector<1x128xf32>
    %cst_67 = arith.constant dense<0.000000e+00> : vector<8xf32>
    %139 = vector.multi_reduction <add>, %136, %cst_67 [1] : vector<8x128xf32> to vector<8xf32>
    %140 = vector.shape_cast %139 : vector<8xf32> to vector<8x1xf32>
    %cst_68 = arith.constant 1.280000e+02 : f32
    %141 = vector.broadcast %cst_68 : f32 to vector<8x1xf32>
    %142 = arith.divf %140, %141 : vector<8x1xf32>
    %143 = vector.broadcast %142 : vector<8x1xf32> to vector<8x128xf32>
    %144 = arith.subf %136, %143 : vector<8x128xf32>
    %145 = arith.mulf %144, %144 : vector<8x128xf32>
    %cst_69 = arith.constant dense<0.000000e+00> : vector<8xf32>
    %146 = vector.multi_reduction <add>, %145, %cst_69 [1] : vector<8x128xf32> to vector<8xf32>
    %147 = vector.shape_cast %146 : vector<8xf32> to vector<8x1xf32>
    %cst_70 = arith.constant 1.280000e+02 : f32
    %148 = vector.broadcast %cst_70 : f32 to vector<8x1xf32>
    %149 = arith.divf %147, %148 : vector<8x1xf32>
    %cst_71 = arith.constant 9.99999974E-6 : f32
    %150 = vector.broadcast %cst_71 : f32 to vector<8x1xf32>
    %151 = arith.addf %149, %150 : vector<8x1xf32>
    %152 = math.rsqrt %151 : vector<8x1xf32>
    %153 = vector.broadcast %152 : vector<8x1xf32> to vector<8x128xf32>
    %154 = arith.mulf %144, %153 : vector<8x128xf32>
    %155 = vector.broadcast %137 : vector<1x128xf32> to vector<8x128xf32>
    %156 = arith.mulf %154, %155 : vector<8x128xf32>
    %157 = vector.broadcast %138 : vector<1x128xf32> to vector<8x128xf32>
    %158 = arith.addf %156, %157 : vector<8x128xf32>
    %159 = arith.mulf %158, %158 : vector<8x128xf32>
    %cst_72 = arith.constant 0.797884583 : f32
    %160 = vector.broadcast %cst_72 : f32 to vector<8x128xf32>
    %161 = arith.mulf %160, %158 : vector<8x128xf32>
    %cst_73 = arith.constant 4.471500e-02 : f32
    %162 = vector.broadcast %cst_73 : f32 to vector<8x128xf32>
    %163 = arith.mulf %162, %159 : vector<8x128xf32>
    %cst_74 = arith.constant 1.000000e+00 : f32
    %164 = vector.broadcast %cst_74 : f32 to vector<8x128xf32>
    %165 = arith.addf %164, %163 : vector<8x128xf32>
    %166 = arith.mulf %161, %165 : vector<8x128xf32>
    %cst_75 = arith.constant 5.000000e-01 : f32
    %167 = vector.broadcast %cst_75 : f32 to vector<8x128xf32>
    %168 = arith.mulf %167, %158 : vector<8x128xf32>
    %169 = math.tanh %166 : vector<8x128xf32>
    %cst_76 = arith.constant 1.000000e+00 : f32
    %170 = vector.broadcast %cst_76 : f32 to vector<8x128xf32>
    %171 = arith.addf %170, %169 : vector<8x128xf32>
    %172 = arith.mulf %168, %171 : vector<8x128xf32>
    %173 = arith.truncf %172 : vector<8x128xf32> to vector<8x128xbf16>
    %c0_77 = arith.constant 0 : index
    %c0_78 = arith.constant 0 : index
    %174 = vector.load %arg16[%c0_77, %c0_78] : memref<128x128xbf16, #tpu.memory_space<vmem>>, vector<128x128xbf16>
    %cst_79 = arith.constant dense<0.000000e+00> : vector<8x128xf32>
    %175 = tpu.matmul %173, %174, %cst_79 {dimension_numbers = #tpu.dot_dimension_numbers<[1], [0], [0], [1], [0, 0, 1, 1], [], []>} : vector<8x128xbf16>, vector<128x128xbf16>, vector<8x128xf32> -> vector<8x128xf32>
    %c0_80 = arith.constant 0 : index
    %c0_81 = arith.constant 0 : index
    %176 = vector.load %arg17[%c0_80, %c0_81] : memref<1x128xf32, #tpu.memory_space<vmem>>, vector<1x128xf32>
    %177 = vector.broadcast %176 : vector<1x128xf32> to vector<8x128xf32>
    %178 = arith.addf %175, %177 : vector<8x128xf32>
    %c0_82 = arith.constant 0 : index
    %c0_83 = arith.constant 0 : index
    %179 = vector.load %arg18[%c0_82, %c0_83] : memref<1x128xf32, #tpu.memory_space<vmem>>, vector<1x128xf32>
    %c0_84 = arith.constant 0 : index
    %c0_85 = arith.constant 0 : index
    %180 = vector.load %arg19[%c0_84, %c0_85] : memref<1x128xf32, #tpu.memory_space<vmem>>, vector<1x128xf32>
    %cst_86 = arith.constant dense<0.000000e+00> : vector<8xf32>
    %181 = vector.multi_reduction <add>, %178, %cst_86 [1] : vector<8x128xf32> to vector<8xf32>
    %182 = vector.shape_cast %181 : vector<8xf32> to vector<8x1xf32>
    %cst_87 = arith.constant 1.280000e+02 : f32
    %183 = vector.broadcast %cst_87 : f32 to vector<8x1xf32>
    %184 = arith.divf %182, %183 : vector<8x1xf32>
    %185 = vector.broadcast %184 : vector<8x1xf32> to vector<8x128xf32>
    %186 = arith.subf %178, %185 : vector<8x128xf32>
    %187 = arith.mulf %186, %186 : vector<8x128xf32>
    %cst_88 = arith.constant dense<0.000000e+00> : vector<8xf32>
    %188 = vector.multi_reduction <add>, %187, %cst_88 [1] : vector<8x128xf32> to vector<8xf32>
    %189 = vector.shape_cast %188 : vector<8xf32> to vector<8x1xf32>
    %cst_89 = arith.constant 1.280000e+02 : f32
    %190 = vector.broadcast %cst_89 : f32 to vector<8x1xf32>
    %191 = arith.divf %189, %190 : vector<8x1xf32>
    %cst_90 = arith.constant 9.99999974E-6 : f32
    %192 = vector.broadcast %cst_90 : f32 to vector<8x1xf32>
    %193 = arith.addf %191, %192 : vector<8x1xf32>
    %194 = math.rsqrt %193 : vector<8x1xf32>
    %195 = vector.broadcast %194 : vector<8x1xf32> to vector<8x128xf32>
    %196 = arith.mulf %186, %195 : vector<8x128xf32>
    %197 = vector.broadcast %179 : vector<1x128xf32> to vector<8x128xf32>
    %198 = arith.mulf %196, %197 : vector<8x128xf32>
    %199 = vector.broadcast %180 : vector<1x128xf32> to vector<8x128xf32>
    %200 = arith.addf %198, %199 : vector<8x128xf32>
    %201 = arith.mulf %200, %200 : vector<8x128xf32>
    %cst_91 = arith.constant 0.797884583 : f32
    %202 = vector.broadcast %cst_91 : f32 to vector<8x128xf32>
    %203 = arith.mulf %202, %200 : vector<8x128xf32>
    %cst_92 = arith.constant 4.471500e-02 : f32
    %204 = vector.broadcast %cst_92 : f32 to vector<8x128xf32>
    %205 = arith.mulf %204, %201 : vector<8x128xf32>
    %cst_93 = arith.constant 1.000000e+00 : f32
    %206 = vector.broadcast %cst_93 : f32 to vector<8x128xf32>
    %207 = arith.addf %206, %205 : vector<8x128xf32>
    %208 = arith.mulf %203, %207 : vector<8x128xf32>
    %cst_94 = arith.constant 5.000000e-01 : f32
    %209 = vector.broadcast %cst_94 : f32 to vector<8x128xf32>
    %210 = arith.mulf %209, %200 : vector<8x128xf32>
    %211 = math.tanh %208 : vector<8x128xf32>
    %cst_95 = arith.constant 1.000000e+00 : f32
    %212 = vector.broadcast %cst_95 : f32 to vector<8x128xf32>
    %213 = arith.addf %212, %211 : vector<8x128xf32>
    %214 = arith.mulf %210, %213 : vector<8x128xf32>
    %215 = arith.truncf %214 : vector<8x128xf32> to vector<8x128xbf16>
    %c0_96 = arith.constant 0 : index
    %c0_97 = arith.constant 0 : index
    %216 = vector.load %arg20[%c0_96, %c0_97] : memref<128x8xbf16, #tpu.memory_space<vmem>>, vector<128x8xbf16>
    %cst_98 = arith.constant dense<0.000000e+00> : vector<8x8xf32>
    %217 = tpu.matmul %215, %216, %cst_98 {dimension_numbers = #tpu.dot_dimension_numbers<[1], [0], [0], [1], [0, 0, 1, 1], [], []>} : vector<8x128xbf16>, vector<128x8xbf16>, vector<8x8xf32> -> vector<8x8xf32>
    %c0_99 = arith.constant 0 : index
    %c0_100 = arith.constant 0 : index
    %218 = vector.load %arg21[%c0_99, %c0_100] : memref<1x8xf32, #tpu.memory_space<vmem>>, vector<1x8xf32>
    %219 = vector.broadcast %218 : vector<1x8xf32> to vector<8x8xf32>
    %220 = arith.addf %217, %219 : vector<8x8xf32>
    %c0_101 = arith.constant 0 : index
    %c0_102 = arith.constant 0 : index
    %221 = vector.load %arg22[%c0_101, %c0_102] : memref<8x8xbf16, #tpu.memory_space<vmem>>, vector<8x8xbf16>
    %cst_103 = arith.constant dense<0.000000e+00> : vector<8x8xf32>
    %222 = tpu.matmul %125, %221, %cst_103 {dimension_numbers = #tpu.dot_dimension_numbers<[1], [0], [0], [1], [0, 0, 1, 1], [], []>} : vector<8x8xbf16>, vector<8x8xbf16>, vector<8x8xf32> -> vector<8x8xf32>
    %223 = arith.addf %220, %222 : vector<8x8xf32>
    %c0_104 = arith.constant 0 : index
    %224 = memref.load %arg23[%c0_104] : memref<1xf32, #tpu.memory_space<smem>>
    %cst_105 = arith.constant 1.000000e-01 : f32
    %cst_106 = arith.constant 5.000000e+00 : f32
    %225 = arith.maximumf %cst_105, %224 : f32
    %226 = arith.minimumf %cst_106, %225 : f32
    %cst_107 = arith.constant 1.000000e+00 : f32
    %227 = arith.divf %cst_107, %226 : f32
    %228 = vector.broadcast %227 : f32 to vector<8x8xf32>
    %229 = arith.mulf %223, %228 : vector<8x8xf32>
    %cst_108 = arith.constant dense<0xFF800000> : vector<8xf32>
    %230 = vector.multi_reduction <maximumf>, %229, %cst_108 [1] : vector<8x8xf32> to vector<8xf32>
    %231 = vector.shape_cast %230 : vector<8xf32> to vector<8x1xf32>
    %232 = vector.broadcast %231 : vector<8x1xf32> to vector<8x8xf32>
    %233 = arith.subf %229, %232 : vector<8x8xf32>
    %234 = math.exp %233 : vector<8x8xf32>
    %cst_109 = arith.constant dense<0.000000e+00> : vector<8xf32>
    %235 = vector.multi_reduction <add>, %234, %cst_109 [1] : vector<8x8xf32> to vector<8xf32>
    %236 = vector.shape_cast %235 : vector<8xf32> to vector<8x1xf32>
    %237 = vector.broadcast %236 : vector<8x1xf32> to vector<8x8xf32>
    %238 = arith.divf %234, %237 : vector<8x8xf32>
    %c0_110 = arith.constant 0 : index
    %c0_111 = arith.constant 0 : index
    %239 = vector.load %arg24[%c0_110, %c0_111] : memref<8x8xf32, #tpu.memory_space<vmem>>, vector<8x8xf32>
    tpu.vector_store %arg24[%c0_110, %c0_111], %238 {strides = array<i32>} : memref<8x8xf32, #tpu.memory_space<vmem>>, vector<8x8xf32>,
    return
  }
  func.func @transform_0(%arg0: i32) -> (i32, i32) {
    %c0_i32 = arith.constant 0 : i32
    %c0_i32_0 = arith.constant 0 : i32
    return %arg0, %c0_i32 : i32, i32
  }
  func.func @transform_1(%arg0: i32) -> (i32, i32) {
    %c0_i32 = arith.constant 0 : i32
    %c0_i32_0 = arith.constant 0 : i32
    %c0_i32_1 = arith.constant 0 : i32
    return %c0_i32, %c0_i32_0 : i32, i32
  }
  func.func @transform_2(%arg0: i32) -> (i32, i32) {
    %c0_i32 = arith.constant 0 : i32
    %c0_i32_0 = arith.constant 0 : i32
    %c0_i32_1 = arith.constant 0 : i32
    return %c0_i32, %c0_i32_0 : i32, i32
  }
  func.func @transform_3(%arg0: i32) -> (i32, i32) {
    %c0_i32 = arith.constant 0 : i32
    %c0_i32_0 = arith.constant 0 : i32
    %c0_i32_1 = arith.constant 0 : i32
    return %c0_i32, %c0_i32_0 : i32, i32
  }
  func.func @transform_4(%arg0: i32) -> (i32, i32) {
    %c0_i32 = arith.constant 0 : i32
    %c0_i32_0 = arith.constant 0 : i32
    %c0_i32_1 = arith.constant 0 : i32
    return %c0_i32, %c0_i32_0 : i32, i32
  }
  func.func @transform_5(%arg0: i32) -> (i32, i32) {
    %c0_i32 = arith.constant 0 : i32
    %c0_i32_0 = arith.constant 0 : i32
    %c0_i32_1 = arith.constant 0 : i32
    return %c0_i32, %c0_i32_0 : i32, i32
  }
  func.func @transform_6(%arg0: i32) -> (i32, i32) {
    %c0_i32 = arith.constant 0 : i32
    %c0_i32_0 = arith.constant 0 : i32
    %c0_i32_1 = arith.constant 0 : i32
    return %c0_i32, %c0_i32_0 : i32, i32
  }
  func.func @transform_7(%arg0: i32) -> (i32, i32) {
    %c0_i32 = arith.constant 0 : i32
    %c0_i32_0 = arith.constant 0 : i32
    %c0_i32_1 = arith.constant 0 : i32
    return %c0_i32, %c0_i32_0 : i32, i32
  }
  func.func @transform_8(%arg0: i32) -> (i32, i32) {
    %c0_i32 = arith.constant 0 : i32
    %c0_i32_0 = arith.constant 0 : i32
    %c0_i32_1 = arith.constant 0 : i32
    return %c0_i32, %c0_i32_0 : i32, i32
  }
  func.func @transform_9(%arg0: i32) -> (i32, i32) {
    %c0_i32 = arith.constant 0 : i32
    %c0_i32_0 = arith.constant 0 : i32
    %c0_i32_1 = arith.constant 0 : i32
    return %c0_i32, %c0_i32_0 : i32, i32
  }
  func.func @transform_10(%arg0: i32) -> (i32, i32) {
    %c0_i32 = arith.constant 0 : i32
    %c0_i32_0 = arith.constant 0 : i32
    %c0_i32_1 = arith.constant 0 : i32
    return %c0_i32, %c0_i32_0 : i32, i32
  }
  func.func @transform_11(%arg0: i32) -> (i32, i32) {
    %c0_i32 = arith.constant 0 : i32
    %c0_i32_0 = arith.constant 0 : i32
    %c0_i32_1 = arith.constant 0 : i32
    return %c0_i32, %c0_i32_0 : i32, i32
  }
  func.func @transform_12(%arg0: i32) -> (i32, i32) {
    %c0_i32 = arith.constant 0 : i32
    %c0_i32_0 = arith.constant 0 : i32
    %c0_i32_1 = arith.constant 0 : i32
    return %c0_i32, %c0_i32_0 : i32, i32
  }
  func.func @transform_13(%arg0: i32) -> (i32, i32) {
    %c0_i32 = arith.constant 0 : i32
    %c0_i32_0 = arith.constant 0 : i32
    %c0_i32_1 = arith.constant 0 : i32
    return %c0_i32, %c0_i32_0 : i32, i32
  }
  func.func @transform_14(%arg0: i32) -> (i32, i32) {
    %c0_i32 = arith.constant 0 : i32
    %c0_i32_0 = arith.constant 0 : i32
    %c0_i32_1 = arith.constant 0 : i32
    return %c0_i32, %c0_i32_0 : i32, i32
  }
  func.func @transform_15(%arg0: i32) -> (i32, i32) {
    %c0_i32 = arith.constant 0 : i32
    %c0_i32_0 = arith.constant 0 : i32
    %c0_i32_1 = arith.constant 0 : i32
    return %c0_i32, %c0_i32_0 : i32, i32
  }
  func.func @transform_16(%arg0: i32) -> (i32, i32) {
    %c0_i32 = arith.constant 0 : i32
    %c0_i32_0 = arith.constant 0 : i32
    %c0_i32_1 = arith.constant 0 : i32
    return %c0_i32, %c0_i32_0 : i32, i32
  }
  func.func @transform_17(%arg0: i32) -> (i32, i32) {
    %c0_i32 = arith.constant 0 : i32
    %c0_i32_0 = arith.constant 0 : i32
    %c0_i32_1 = arith.constant 0 : i32
    return %c0_i32, %c0_i32_0 : i32, i32
  }
  func.func @transform_18(%arg0: i32) -> (i32, i32) {
    %c0_i32 = arith.constant 0 : i32
    %c0_i32_0 = arith.constant 0 : i32
    %c0_i32_1 = arith.constant 0 : i32
    return %c0_i32, %c0_i32_0 : i32, i32
  }
  func.func @transform_19(%arg0: i32) -> (i32, i32) {
    %c0_i32 = arith.constant 0 : i32
    %c0_i32_0 = arith.constant 0 : i32
    %c0_i32_1 = arith.constant 0 : i32
    return %c0_i32, %c0_i32_0 : i32, i32
  }
  func.func @transform_20(%arg0: i32) -> (i32, i32) {
    %c0_i32 = arith.constant 0 : i32
    %c0_i32_0 = arith.constant 0 : i32
    %c0_i32_1 = arith.constant 0 : i32
    return %c0_i32, %c0_i32_0 : i32, i32
  }
  func.func @transform_21(%arg0: i32) -> (i32, i32) {
    %c0_i32 = arith.constant 0 : i32
    %c0_i32_0 = arith.constant 0 : i32
    %c0_i32_1 = arith.constant 0 : i32
    return %c0_i32, %c0_i32_0 : i32, i32
  }
  func.func @transform_22(%arg0: i32) -> i32 {
    %c0_i32 = arith.constant 0 : i32
    %c0_i32_0 = arith.constant 0 : i32
    return %c0_i32 : i32
  }
  func.func @transform_23(%arg0: i32) -> (i32, i32) {
    %c0_i32 = arith.constant 0 : i32
    %c0_i32_0 = arith.constant 0 : i32
    return %arg0, %c0_i32 : i32, i32
  }
}

</mosaic_0001>

<bundles_post_ra>
// kernel: tpu_custom_call.1
= control target key start
LH: loop header
LB: loop body
LE: loop exit
PB: predicated region body
PF: predicated region fallthrough
CT: control target
= control target key end

     0   :  { %s1762_s0 = inlined_call_operand.hbm [shape: f32[8,32], index: 0, kind: input, shape index: {}]   ;;  %s1763_s1 = inlined_call_operand.vmem [shape: bf16[32,64], index: 1, kind: input, shape index: {}]   ;;  %s1764_s2 = inlined_call_operand.vmem [shape: f32[1,64], index: 2, kind: input, shape index: {}]   ;;  %s1765_s3 = inlined_call_operand.vmem [shape: f32[1,64], index: 3, kind: input, shape index: {}]   ;;  %s1766_s4 = inlined_call_operand.hbm [shape: f32[1,64], index: 4, kind: input, shape index: {}]   ;;  %s1767_s5 = inlined_call_operand.vmem [shape: bf16[64,32], index: 5, kind: input, shape index: {}]   ;;  %s1768_s6 = inlined_call_operand.hbm [shape: f32[1,32], index: 6, kind: input, shape index: {}]   ;;  %s1769_s7 = inlined_call_operand.vmem [shape: bf16[32,8], index: 7, kind: input, shape index: {}]   ;;  %s1770_s8 = inlined_call_operand.vmem [shape: f32[1,8], index: 8, kind: input, shape index: {}]   ;;  %s1771_s9 = inlined_call_operand.vmem [shape: bf16[32,128], index: 9, kind: input, shape index: {}]   ;;  %s1772_s10 = inlined_call_operand.vmem [shape: bf16[64,128], index: 10, kind: input, shape index: {}]   ;;  %s1773_s11 = inlined_call_operand.vmem [shape: bf16[8,128], index: 11, kind: input, shape index: {}]   ;;  %s1774_s12 = inlined_call_operand.vmem [shape: f32[1,128], index: 12, kind: input, shape index: {}]   ;;  %s1775_s13 = inlined_call_operand.vmem [shape: f32[1,128], index: 13, kind: input, shape index: {}]   ;;  %s1776_s14 = inlined_call_operand.vmem [shape: f32[1,128], index: 14, kind: input, shape index: {}]   ;;  %s1777_s15 = inlined_call_operand.vmem [shape: bf16[128,128], index: 15, kind: input, shape index: {}]   ;;  %s1778_s16 = inlined_call_operand.vmem [shape: f32[1,128], index: 16, kind: input, shape index: {}]   ;;  %s1779_s17 = inlined_call_operand.vmem [shape: f32[1,128], index: 17, kind: input, shape index: {}]   ;;  %s1780_s18 = inlined_call_operand.vmem [shape: f32[1,128], index: 18, kind: input, shape index: {}]   ;;  %s1781_s19 = inlined_call_operand.vmem [shape: bf16[128,8], index: 19, kind: input, shape index: {}]   ;;  %s1782_s20 = inlined_call_operand.vmem [shape: f32[1,8], index: 20, kind: input, shape index: {}]   ;;  %s1783_s21 = inlined_call_operand.vmem [shape: bf16[8,8], index: 21, kind: input, shape index: {}]   ;;  %s1784_s22 = inlined_call_operand.<no memory space> [shape: f32[1], index: 22, kind: input, shape index: {}]   ;;  %s1785_s23 = inlined_call_operand.hbm [shape: f32[8,8], index: 23, kind: output, shape index: {}]  }
   0x1   :  { %1792 = sst [smem:[#allocation13_spill]] %s1762_s0 }
   0x2   :  { %1793 = sst [smem:[#allocation14_spill]] %s1763_s1 }
   0x3   :  { %1794 = sst [smem:[#allocation15_spill]] %s1764_s2 }
   0x4   :  { %1795 = sst [smem:[#allocation16_spill]] %s1765_s3 }
   0x5   :  { %1796 = sst [smem:[#allocation17_spill]] %s1766_s4 }
   0x6   :  { %1797 = sst [smem:[#allocation18_spill]] %s1767_s5 }
   0x7   :  { %1798 = sst [smem:[#allocation19_spill]] %s1768_s6 }
   0x8   :  { %1799 = sst [smem:[#allocation20_spill]] %s1769_s7 }
   0x9   :  { %29 = vsyncpa [#allocation4], 0 }
   0xa   :  { %30 = vsyncpa [#allocation7], 0 }
   0xb   :  { %31 = vsyncpa [#allocation5], 0  ;;  %s1370_s4 = smov [#allocation6]   ;;  %s1371_s24 = smov [#allocation3]  }
   0xc   :  { %s54_s30 = sshll.u32 %s1370_s4, 4  ;;  %s38_s25 = sshll.u32 %s1371_s24, 4  ;;  %s55_s30 = int_to_ptr.vmem [resolvable:$true] %s54_s30  ;;  %s39_s25 = int_to_ptr.vmem [resolvable:$true] %s38_s25 }
   0xd   :  { %s1800_s26 = sld [smem:[#allocation17_spill]] }
  0x13   :  { %s1276_s2 = scalar_lea.hbm %s1800_s26, 16 }
  0x14   :  { %p1277_p0 = scmp.ne.s32.totalorder %s1800_s26, %s1276_s2  ;;  %p1280_p1 = scmp.lt.u32.totalorder %s1276_s2, %s1800_s26 }
  0x16   :  { %p1282_p2 = pnand %p1280_p1, %p1277_p0 }
  0x18   :  { %1285 = shalt.err (!%p1282_p2)
}
  0x19   :  { %s1286_s29 = scalar_lea.vmem %s55_s30, 16  ;;  %s1290_s3 = scalar_lea.vmem %s55_s30, 32 }
  0x1a   :  { %p1287_p3 = scmp.ne.s32.totalorder %s55_s30, %s1286_s29  ;;  %p1291_p4 = scmp.lt.s32.totalorder %s55_s30, %s55_s30 }
  0x1b   :  { %p1292_p5 = scmp.lt.s32.totalorder %s1290_s3, %s1286_s29 }
  0x1d   :  { %p1293_p6 = por %p1292_p5, %p1291_p4 }
  0x1f   :  { %p1294_p7 = pnand %p1293_p6, %p1287_p3 }
  0x21   :  { %1297 = shalt.err (!%p1294_p7)
}
  0x22   :  { %57 = dma.hbm_to_vmem [thread:$0]  %s1800_s26, 16, %s55_s30, [#allocation7]  }
  0x23   :  { %s1801_s1 = sld [smem:[#allocation13_spill]] }
  0x29   :  { %s1298_s6 = scalar_lea.hbm %s1801_s1, 128 }
  0x2a   :  { %p1299_p8 = scmp.ne.s32.totalorder %s1801_s1, %s1298_s6  ;;  %p1302_p9 = scmp.lt.u32.totalorder %s1298_s6, %s1801_s1 }
  0x2c   :  { %p1304_p10 = pnand %p1302_p9, %p1299_p8 }
  0x2e   :  { %1307 = shalt.err (!%p1304_p10)
}
  0x2f   :  { %s1308_s29 = scalar_lea.vmem %s39_s25, 128  ;;  %p1313_p12 = scmp.lt.s32.totalorder %s39_s25, %s39_s25 }
  0x30   :  { %p1309_p11 = scmp.ne.s32.totalorder %s39_s25, %s1308_s29  ;;  %p1314_p13 = scmp.lt.s32.totalorder %s1308_s29, %s1308_s29 }
  0x32   :  { %p1315_p0 = por %p1314_p13, %p1313_p12 }
  0x34   :  { %p1316_p1 = pnand %p1315_p0, %p1309_p11 }
  0x36   :  { %1319 = shalt.err (!%p1316_p1)
}
  0x37   :  { %41 = dma.hbm_to_vmem [thread:$0]  %s1801_s1, 128, %s39_s25, [#allocation4]  }
  0x38   :  { %s1372_s3 = smov [#allocation8]   ;;  %s1802_s5 = sld [smem:[#allocation19_spill]] }
  0x39   :  { %s66_s0 = sshll.u32 %s1372_s3, 4  ;;  %s67_s0 = int_to_ptr.vmem [resolvable:$true] %s66_s0 }
  0x3e   :  { %s1320_s6 = scalar_lea.hbm %s1802_s5, 16 }
  0x3f   :  { %p1321_p2 = scmp.ne.s32.totalorder %s1802_s5, %s1320_s6  ;;  %p1324_p3 = scmp.lt.u32.totalorder %s1320_s6, %s1802_s5 }
  0x41   :  { %p1326_p4 = pnand %p1324_p3, %p1321_p2 }
  0x43   :  { %1329 = shalt.err (!%p1326_p4)
}
  0x44   :  { %s1330_s29 = scalar_lea.vmem %s67_s0, 16  ;;  %s1334_s25 = scalar_lea.vmem %s67_s0, 32 }
  0x45   :  { %p1331_p5 = scmp.ne.s32.totalorder %s67_s0, %s1330_s29  ;;  %p1335_p6 = scmp.lt.s32.totalorder %s67_s0, %s67_s0 }
  0x46   :  { %p1336_p7 = scmp.lt.s32.totalorder %s1334_s25, %s1330_s29 }
  0x48   :  { %p1337_p8 = por %p1336_p7, %p1335_p6 }
  0x4a   :  { %p1338_p9 = pnand %p1337_p8, %p1331_p5 }
  0x4c   :  { %1341 = shalt.err (!%p1338_p9)
}
  0x4d   :  { %69 = dma.hbm_to_vmem [thread:$0]  %s1802_s5, 16, %s67_s0, [#allocation7]  }
  0x4e   :  { %1364 = dma.done.wait [#allocation4], 128  }
  0x4f   :  { %1365 = vsyncadd [#allocation4], 4294967168 }
  0x50   :  { %1366 = dma.done.wait [#allocation7], 32  }
  0x51   :  { %1367 = vsyncadd [#allocation7], 4294967264  ;;  %v1373_v0 = vmov 0.0   ;;  %vm1374_vm0 = vmmov 0   ;;  %s1803_s4 = sld [smem:[#allocation14_spill]]  ;;  %v112_v3 = vld [vmem:[#allocation3] sm:$0xff] }
  0x52   :  { %1102 = vmatprep.subr.bf16.mxu0 %v1373_v0  ;;  %1106 = vmatprep.mubr.msk.bf16.mxu0 %vm1374_vm0, %v1373_v0  ;;  %vm137_vm1 = vcmask 261120   ;;  %v1550_v4 = vpack.c.bf16 %v112_v3, %v112_v3  ;;  %s1804_s27 = sld [smem:[#allocation15_spill]]  ;;  %s1375_s2 = smov 80   ;;  %vm184_vm2 = vcmask 130048   ;;  %vm282_vm3 = vcmask 392192  }
  0x53   :  { %1110 = vmatprep.subr.bf16.mxu1 %v1373_v0  ;;  %1118 = vmatprep.mubr.msk.bf16.mxu1 %vm1374_vm0, %v1373_v0  ;;  %s1376_s7 = smov 112   ;;  %s1377_s28 = smov 96   ;;  %vm324_vm4 = vcmask 523264   ;;  %vm436_vm5 = vcmask 64512   ;;  %vm581_vm6 = vcmask 1043456  }
  0x54   :  { %s1805_s1 = sld [smem:[#allocation18_spill]] }
  0x57   :  { %v1220_v1 = vld [vmem:[%s1803_s4] sm:$0xff]   ;;  %v1221_v2 = vld [vmem:[%s1803_s4 + $0x8] sm:$0xff]  }
  0x58   :  { %1103 = vmatpush3.bf16.msra.mxu0 %v1220_v1  ;;  %v1012_v5 = vld [vmem:[%s1804_s27] ss:$0 sm:$0xff]  ;;  %s1806_s27 = sld [smem:[#allocation20_spill]] }
  0x59   :  { %1104 = vmatprep.subr.bf16.mxu0 %v1373_v0 }
  0x5a   :  { %v1222_v42 = vld [vmem:[%s1805_s1] sm:$0xff]   ;;  %v1223_v43 = vld [vmem:[%s1805_s1 + $0x8] sm:$0xff]   ;;  %v1224_v44 = vld [vmem:[%s1805_s1 + $0x10] sm:$0xff]  }
  0x5b   :  { %1111 = vmatpush3.bf16.msra.mxu1 %v1222_v42  ;;  %v1225_v45 = vld [vmem:[%s1805_s1 + $0x18] sm:$0xff]  }
  0x5c   :  { %1105 = vmatpush3.bf16.msra.mxu0 %v1221_v2  ;;  %1112 = vmatprep.subr.bf16.mxu1 %v1373_v0 }
  0x5d   :  { %1122 = vmatprep.subr.bf16.mxu0 %v1373_v0 }
  0x5e   :  { %v1226_v46 = vld [vmem:[%s1806_s27] sm:$0xff]  }
  0x5f   :  { %1107 = vmatmul.mubr.msk.bf16.vlgmr.msra.gmra.mrb[0].mxu0 %vm137_vm1, %v1550_v4  ;;  %1113 = vmatpush3.bf16.msra.mxu1 %v1223_v43 }
  0x60   :  { %1126 = vmatprep.mubr.msk.bf16.mxu0 %vm1374_vm0, %v1373_v0  ;;  %1114 = vmatprep.subr.bf16.mxu1 %v1373_v0 }
  0x61   :  { %1123 = vmatpush3.bf16.msra.mxu0 %v1226_v46 }
  0x62   :  { %1124 = vmatprep.subr.bf16.mxu0 %v1373_v0 }
  0x63   :  { %1115 = vmatpush3.bf16.msra.mxu1 %v1224_v44 }
  0x64   :  { %1116 = vmatprep.subr.bf16.mxu1 %v1373_v0 }
  0x67   :  { %1117 = vmatpush3.bf16.msra.mxu1 %v1225_v45 }
  0x68   :  { %1142 = vmatprep.subr.bf16.mxu1 %v1373_v0 }
 0x132   :  { %v175_v6 = vpop.f32.mrb[0].mxu0 }
 0x133   :  { %v176_v7 = vadd.f32 %v1012_v5, %v175_v6  ;;  %v1108_v8 = vpop.f32.mrb[1].mxu0 }
 0x134   :  { %v178_v9 = vpop.f32.mrb[2].mxu0  ;;  %v1017_v8 = vld [vmem:[#allocation6] ss:$0 sm:$0xff] }
 0x135   :  { %v181_v10 = vmax.f32 %v176_v7, 0.0  ;;  %v1109_v11 = vpop.f32.mrb[3].mxu0 }
 0x137   :  { %258 = vrot.lane.b32.xlu1 %v181_v10, %s1375_s2  ;;  %214 = vrot.lane.b32.xlu0 %v181_v10, %s1376_s7  ;;  %v185_v16 = vsel %vm184_vm2, %v181_v10, 0.0 }
 0x13b   :  { %236 = vrot.lane.b32.xlu0 %v181_v10, %s1377_s28 }
 0x1a9   :  { %v215_v12 = vpop.permute.xlu0 %214  ;;  %v259_v17 = vpop.permute.xlu1 %258 }
 0x1aa   :  { %v217_v13 = vsel %vm184_vm2, %v215_v12, 0.0  ;;  %v261_v18 = vsel %vm184_vm2, %v259_v17, 0.0 }
 0x1ab   :  { %218 = vadd.xlane.f32.xlu1 %v217_v13 }
 0x1ad   :  { %v237_v14 = vpop.permute.xlu0 %236 }
 0x1ae   :  { %v239_v15 = vsel %vm184_vm2, %v237_v14, 0.0 }
 0x1af   :  { %240 = vadd.xlane.f32.xlu0 %v239_v15  ;;  %186 = vadd.xlane.f32.xlu1 %v185_v16 }
 0x1b3   :  { %262 = vadd.xlane.f32.xlu0 %v261_v18 }
 0x238   :  { %v219_v19 = vpop.xlane.xlu1 %218 }
 0x239   :  { %v220_v20 = vmul.f32 0.0625, %v219_v19  ;;  %v1227_v19 = vld [vmem:[%s1806_s27 + $0x8] sm:$0xff]  }
 0x23a   :  { %1125 = vmatpush3.bf16.msra.mxu0 %v1227_v19 }
 0x23b   :  { %v221_v21 = vsub.f32 %v181_v10, %v220_v20  ;;  %1130 = vmatprep.subr.bf16.mxu0 %v1373_v0  ;;  %v1231_v20 = vld [vmem:[%s1771_s9] sm:$0xff]  }
 0x23c   :  { %v241_v22 = vpop.xlane.xlu0 %240  ;;  %v187_v31 = vpop.xlane.xlu1 %186 }
 0x23d   :  { %v242_v23 = vmul.f32 0.0625, %v241_v22  ;;  %v222_v24 = vmul.f32 %v221_v21, %v221_v21  ;;  %v189_v32 = vmul.f32 0.0625, %v187_v31  ;;  %v1018_v22 = vld [vmem:[#allocation8] ss:$0 sm:$0xff]  ;;  %v1230_v31 = vld [vmem:[%s1772_s10 + $0x10] sm:$0xff]  }
 0x23f   :  { %v243_v25 = vsub.f32 %v181_v10, %v242_v23  ;;  %224 = vrot.lane.b32.xlu0 %v222_v24, %s1376_s7  ;;  %v190_v33 = vsub.f32 %v181_v10, %v189_v32  ;;  %v1232_v32 = vld [vmem:[%s1772_s10 + $0x18] sm:$0xff]   ;;  %s1378_s7 = smov 0.1  }
 0x240   :  { %v263_v26 = vpop.xlane.xlu0 %262 }
 0x241   :  { %v264_v27 = vmul.f32 0.0625, %v263_v26  ;;  %v244_v28 = vmul.f32 %v243_v25, %v243_v25  ;;  %v191_v34 = vmul.f32 %v190_v33, %v190_v33 }
 0x243   :  { %v265_v29 = vsub.f32 %v181_v10, %v264_v27  ;;  %246 = vrot.lane.b32.xlu1 %v244_v28, %s1377_s28  ;;  %v192_v35 = vsel %vm184_vm2, %v191_v34, 0.0  ;;  %s1807_s28 = sld [smem:[#allocation16_spill]] }
 0x245   :  { %v266_v30 = vmul.f32 %v265_v29, %v265_v29 }
 0x247   :  { %268 = vrot.lane.b32.xlu1 %v266_v30, %s1375_s2 }
 0x249   :  { %v1016_v1 = vld [vmem:[%s1807_s28] ss:$0 sm:$0xff] }
 0x25e   :  { %193 = vadd.xlane.f32.xlu0 %v192_v35 }
 0x2b1   :  { %v225_v36 = vpop.permute.xlu0 %224 }
 0x2b2   :  { %v227_v37 = vsel %vm184_vm2, %v225_v36, 0.0 }
 0x2b3   :  { %228 = vadd.xlane.f32.xlu1 %v227_v37  ;;  %v1024_v37 = vld [vmem:[%s1770_s8] ss:$0 sm:$0xff] }
 0x2b5   :  { %v247_v38 = vpop.permute.xlu1 %246 }
 0x2b6   :  { %v249_v39 = vsel %vm184_vm2, %v247_v38, 0.0 }
 0x2b7   :  { %250 = vadd.xlane.f32.xlu0 %v249_v39 }
 0x2b9   :  { %v269_v40 = vpop.permute.xlu1 %268 }
 0x2ba   :  { %v271_v41 = vsel %vm184_vm2, %v269_v40, 0.0 }
 0x2bb   :  { %272 = vadd.xlane.f32.xlu0 %v271_v41 }
 0x2eb   :  { %v194_v47 = vpop.xlane.xlu0 %193 }
 0x2ec   :  { %v195_v48 = vmul.f32 0.0625, %v194_v47 }
 0x2ee   :  { %v196_v49 = vadd.f32 1e-05, %v195_v48 }
 0x2f0   :  { %1250 = vrsqrt.f32 %v196_v49 }
 0x2fa   :  { %v1251_v59 = vpop.eup %1250 }
 0x2fb   :  { %v198_v62 = vmul.f32 %v1251_v59, %v190_v33 }
 0x2fd   :  { %v205_v5 = vmul.f32 %v1016_v1, %v198_v62 }
 0x2ff   :  { %v212_v12 = vadd.f32 %v1017_v8, %v205_v5 }
 0x340   :  { %v229_v50 = vpop.xlane.xlu1 %228 }
 0x341   :  { %v230_v51 = vmul.f32 0.0625, %v229_v50 }
 0x343   :  { %v231_v52 = vadd.f32 1e-05, %v230_v51 }
 0x344   :  { %v251_v53 = vpop.xlane.xlu0 %250 }
 0x345   :  { %1252 = vrsqrt.f32 %v231_v52  ;;  %v252_v54 = vmul.f32 0.0625, %v251_v53 }
 0x347   :  { %v253_v55 = vadd.f32 1e-05, %v252_v54  ;;  %v577_v54 = vld [vmem:[%s1773_s11] sm:$0xf]  ;;  %s1379_s11 = smov 5.0  }
 0x348   :  { %v273_v56 = vpop.xlane.xlu0 %272 }
 0x349   :  { %1254 = vrsqrt.f32 %v253_v55  ;;  %v274_v57 = vmul.f32 0.0625, %v273_v56  ;;  %v583_v55 = vsel %vm581_vm6, %v577_v54, 0 }
 0x34b   :  { %v275_v58 = vadd.f32 1e-05, %v274_v57 }
 0x34d   :  { %1256 = vrsqrt.f32 %v275_v58 }
 0x34f   :  { %v1253_v60 = vpop.eup %1252 }
 0x350   :  { %v233_v61 = vmul.f32 %v1253_v60, %v221_v21  ;;  %v1233_v21 = vld [vmem:[%s1771_s9 + $0x8] sm:$0xff]  }
 0x352   :  { %v234_v2 = vmul.f32 %v1016_v1, %v233_v61  ;;  %v1037_v61 = vld [vmem:[%s1774_s12] ss:$0 sm:$0xff] }
 0x353   :  { %v1255_v63 = vpop.eup %1254 }
 0x354   :  { %v255_v3 = vmul.f32 %v1255_v63, %v243_v25  ;;  %v235_v10 = vadd.f32 %v1017_v8, %v234_v2 }
 0x356   :  { %v256_v6 = vmul.f32 %v1016_v1, %v255_v3  ;;  %v280_v15 = vsel %vm184_vm2, %v212_v12, %v235_v10  ;;  %v1235_v10 = vld [vmem:[%s1777_s15 + $0x8] sm:$0xff]   ;;  %v1237_v12 = vld [vmem:[%s1777_s15 + $0x18] sm:$0xff]  }
 0x357   :  { %v1257_v7 = vpop.eup %1256 }
 0x358   :  { %v277_v9 = vmul.f32 %v1257_v7, %v265_v29  ;;  %v257_v11 = vadd.f32 %v1017_v8, %v256_v6  ;;  %v1228_v29 = vld [vmem:[%s1772_s10] sm:$0xff]  }
 0x35a   :  { %v278_v13 = vmul.f32 %v1016_v1, %v277_v9  ;;  %v281_v16 = vsel %vm137_vm1, %v280_v15, %v257_v11  ;;  %v1234_v9 = vld [vmem:[%s1777_s15] sm:$0xff]   ;;  %v1236_v11 = vld [vmem:[%s1777_s15 + $0x10] sm:$0xff]  }
 0x35b   :  { %v1240_v15 = vld [vmem:[%s1777_s15 + $0x30] sm:$0xff]  }
 0x35c   :  { %v279_v14 = vadd.f32 %v1017_v8, %v278_v13  ;;  %v1238_v13 = vld [vmem:[%s1777_s15 + $0x20] sm:$0xff]  }
 0x35e   :  { %v283_v17 = vsel %vm282_vm3, %v281_v16, %v279_v14  ;;  %v1239_v14 = vld [vmem:[%s1777_s15 + $0x28] sm:$0xff]   ;;  %v1241_v16 = vld [vmem:[%s1777_s15 + $0x38] sm:$0xff]  }
 0x35f   :  { %v284_v18 = vpack.c.bf16 %v283_v17, %v283_v17 }
 0x361   :  { %1119 = vmatmul.mubr.msk.bf16.vlgmr.msra.gmra.mrb[0].mxu1 %vm324_vm4, %v284_v18 }
 0x362   :  { %1146 = vmatprep.mubr.msk.bf16.mxu1 %vm1374_vm0, %v1373_v0  ;;  %1143 = vmatpush3.bf16.msra.mxu1 %v1231_v20 }
 0x363   :  { %1144 = vmatprep.subr.bf16.mxu1 %v1373_v0 }
 0x366   :  { %1145 = vmatpush3.bf16.msra.mxu1 %v1233_v21  ;;  %v1038_v21 = vld [vmem:[%s1775_s13] ss:$0 sm:$0xff] }
 0x367   :  { %1150 = vmatprep.subr.bf16.mxu1 %v1373_v0 }
 0x369   :  { %1147 = vmatmul.mubr.msk.bf16.vlgmr.msra.gmra.mrb[4].mxu1 %vm137_vm1, %v1550_v4  ;;  %v1229_v4 = vld [vmem:[%s1772_s10 + $0x8] sm:$0xff]   ;;  %s977_s10 = smax.f32 %s1378_s7, %s1784_s22 }
 0x36a   :  { %1152 = vmatprep.mubr.msk.bf16.mxu1 %vm1374_vm0, %v1373_v0  ;;  %1151 = vmatpush3.bf16.msra.mxu1 %v583_v55  ;;  %s978_s29 = smin.f32 %s1379_s11, %s977_s10 }
 0x36b   :  { %1176 = vmatprep.subr.bf16.mxu1 %v1373_v0 }
 0x434   :  { %v362_v23 = vpop.f32.mrb[0].mxu1 }
 0x435   :  { %v363_v24 = vadd.f32 %v1018_v22, %v362_v23  ;;  %v1120_v25 = vpop.f32.mrb[1].mxu1  ;;  %v1039_v23 = vld [vmem:[%s1776_s14] ss:$0 sm:$0xff] }
 0x436   :  { %v365_v26 = vpop.f32.mrb[2].mxu1 }
 0x437   :  { %v368_v27 = vmax.f32 %v363_v24, 0.0  ;;  %v1121_v28 = vpop.f32.mrb[3].mxu1 }
 0x439   :  { %v369_v30 = vpack.c.bf16 %v368_v27, %v368_v27 }
 0x43b   :  { %1127 = vmatmul.mubr.msk.bf16.vlgmr.msra.gmra.mrb[4].mxu0 %vm137_vm1, %v369_v30 }
 0x43c   :  { %1131 = vmatpush3.bf16.msra.mxu0 %v1228_v29  ;;  %1138 = vmatprep.mubr.msk.bf16.mxu0 %vm1374_vm0, %v1373_v0  ;;  %v571_v33 = vpop.f32.mrb[4].mxu1 }
 0x43d   :  { %1132 = vmatprep.subr.bf16.mxu0 %v1373_v0  ;;  %v1148_v34 = vpop.f32.mrb[5].mxu1 }
 0x43e   :  { %v574_v35 = vpop.f32.mrb[6].mxu1 }
 0x43f   :  { %v1149_v36 = vpop.f32.mrb[7].mxu1  ;;  %v1040_v35 = vld [vmem:[%s1778_s16] ss:$0 sm:$0xff] }
 0x440   :  { %1133 = vmatpush3.bf16.msra.mxu0 %v1229_v4 }
 0x441   :  { %1134 = vmatprep.subr.bf16.mxu0 %v1373_v0 }
 0x444   :  { %1135 = vmatpush3.bf16.msra.mxu0 %v1230_v31 }
 0x445   :  { %1136 = vmatprep.subr.bf16.mxu0 %v1373_v0 }
 0x448   :  { %1137 = vmatpush3.bf16.msra.mxu0 %v1232_v32 }
 0x449   :  { %1156 = vmatprep.subr.bf16.mxu0 %v1373_v0 }
 0x44b   :  { %1139 = vmatmul.mubr.msk.bf16.vlgmr.msra.gmra.mrb[8].mxu0 %vm324_vm4, %v284_v18 }
 0x44c   :  { %1172 = vmatprep.mubr.msk.bf16.mxu0 %vm1374_vm0, %v1373_v0  ;;  %1157 = vmatpush3.bf16.msra.mxu0 %v1234_v9 }
 0x44d   :  { %1158 = vmatprep.subr.bf16.mxu0 %v1373_v0 }
 0x450   :  { %1159 = vmatpush3.bf16.msra.mxu0 %v1235_v10 }
 0x451   :  { %1160 = vmatprep.subr.bf16.mxu0 %v1373_v0 }
 0x454   :  { %1161 = vmatpush3.bf16.msra.mxu0 %v1236_v11  ;;  %v931_v11 = vld [vmem:[%s1783_s21] sm:$0xf] }
 0x455   :  { %1162 = vmatprep.subr.bf16.mxu0 %v1373_v0 }
 0x458   :  { %1163 = vmatpush3.bf16.msra.mxu0 %v1237_v12 }
 0x459   :  { %1164 = vmatprep.subr.bf16.mxu0 %v1373_v0 }
 0x45c   :  { %1165 = vmatpush3.bf16.msra.mxu0 %v1238_v13 }
 0x45d   :  { %1166 = vmatprep.subr.bf16.mxu0 %v1373_v0 }
 0x460   :  { %1167 = vmatpush3.bf16.msra.mxu0 %v1239_v14  ;;  %v933_v14 = vsel %vm581_vm6, %v931_v11, 0 }
 0x461   :  { %1168 = vmatprep.subr.bf16.mxu0 %v1373_v0 }
 0x464   :  { %1169 = vmatpush3.bf16.msra.mxu0 %v1240_v15  ;;  %v1051_v15 = vld [vmem:[%s1782_s20] ss:$0 sm:$0xff]  ;;  %s1380_s20 = smov [#allocation9]  }
 0x465   :  { %1170 = vmatprep.subr.bf16.mxu0 %v1373_v0  ;;  %s1002_s21 = sshll.u32 %s1380_s20, 4  ;;  %s1003_s21 = int_to_ptr.vmem [resolvable:$true] %s1002_s21 }
 0x466   :  { %s1342_s16 = scalar_lea.vmem %s1003_s21, 128  ;;  %p1347_p11 = scmp.lt.s32.totalorder %s1003_s21, %s1003_s21 }
 0x467   :  { %p1343_p10 = scmp.ne.s32.totalorder %s1003_s21, %s1342_s16  ;;  %p1348_p12 = scmp.lt.s32.totalorder %s1342_s16, %s1342_s16 }
 0x468   :  { %1171 = vmatpush3.bf16.msra.mxu0 %v1241_v16 }
 0x469   :  { %p1349_p13 = por %p1348_p12, %p1347_p11 }
 0x46b   :  { %p1350_p0 = pnand %p1349_p13, %p1343_p10 }
 0x50e   :  { %v430_v38 = vpop.f32.mrb[4].mxu0 }
 0x50f   :  { %v431_v39 = vadd.f32 %v1024_v37, %v430_v38  ;;  %v1128_v40 = vpop.f32.mrb[5].mxu0 }
 0x510   :  { %v433_v41 = vpop.f32.mrb[6].mxu0 }
 0x511   :  { %v1129_v42 = vpop.f32.mrb[7].mxu0  ;;  %v437_v43 = vsel %vm436_vm5, %v431_v39, -inf }
 0x512   :  { %438 = vmax.xlane.f32.xlu1 %v437_v43 }
 0x51e   :  { %v519_v44 = vpop.f32.mrb[8].mxu0 }
 0x51f   :  { %v572_v45 = vadd.f32 %v571_v33, %v519_v44  ;;  %v1140_v46 = vpop.f32.mrb[9].mxu0 }
 0x520   :  { %v522_v47 = vpop.f32.mrb[10].mxu0  ;;  %v1243_v46 = vld [vmem:[%s1781_s19 + $0x8] sm:$0xff]  }
 0x521   :  { %v1141_v48 = vpop.f32.mrb[11].mxu0  ;;  %v1244_v47 = vld [vmem:[%s1781_s19 + $0x10] sm:$0xff]  }
 0x522   :  { %v1245_v48 = vld [vmem:[%s1781_s19 + $0x18] sm:$0xff]  }
 0x59f   :  { %v439_v49 = vpop.xlane.xlu1 %438 }
 0x5a0   :  { %v440_v50 = vsub.f32 %v431_v39, %v439_v49  ;;  %v1246_v49 = vld [vmem:[%s1781_s19 + $0x20] sm:$0xff]  }
 0x5a2   :  { %v441_v51 = vmul.f32 1.442695, %v440_v50  ;;  %v1247_v50 = vld [vmem:[%s1781_s19 + $0x28] sm:$0xff]  }
 0x5a4   :  { %1258 = vpow2.f32 %v441_v51  ;;  %v1248_v51 = vld [vmem:[%s1781_s19 + $0x30] sm:$0xff]  }
 0x5ae   :  { %v1259_v52 = vpop.eup %1258 }
 0x5af   :  { %v443_v53 = vsel %vm436_vm5, %v1259_v52, 0.0 }
 0x5b0   :  { %444 = vadd.xlane.f32.xlu0 %v443_v53  ;;  %v979_v53 = vstv %s978_s29 }
 0x63d   :  { %v445_v56 = vpop.xlane.xlu0 %444 }
 0x63e   :  { %1260 = vrcp.f32 %v445_v56 }
 0x648   :  { %v1261_v57 = vpop.eup %1260 }
 0x649   :  { %v447_v58 = vmul.f32 %v1261_v57, %v1259_v52  ;;  %v1249_v52 = vld [vmem:[%s1781_s19 + $0x38] sm:$0xff]  }
 0x64b   :  { %v1646_v59 = vpack.c.bf16 %v447_v58, %v447_v58 }
 0x64d   :  { %1153 = vmatmul.mubr.msk.bf16.vlgmr.msra.gmra.mrb[8].mxu1 %vm436_vm5, %v1646_v59 }
 0x64e   :  { %1192 = vmatprep.mubr.msk.bf16.mxu1 %vm1374_vm0, %v1373_v0 }
 0x720   :  { %v619_v60 = vpop.f32.mrb[8].mxu1 }
 0x721   :  { %v625_v62 = vadd.f32 %v619_v60, %v572_v45  ;;  %v1154_v63 = vpop.f32.mrb[9].mxu1  ;;  %v1242_v45 = vld [vmem:[%s1781_s19] sm:$0xff]  }
 0x722   :  { %v622_v1 = vpop.f32.mrb[10].mxu1  ;;  %1177 = vmatpush3.bf16.msra.mxu1 %v1242_v45  ;;  %v1049_v60 = vld [vmem:[%s1779_s17] ss:$0 sm:$0xff] }
 0x723   :  { %v1155_v2 = vpop.f32.mrb[11].mxu1  ;;  %v633_v3 = vadd.f32 %v1037_v61, %v625_v62  ;;  %1178 = vmatprep.subr.bf16.mxu1 %v1373_v0  ;;  %v1050_v62 = vld [vmem:[%s1780_s18] ss:$0 sm:$0xff] }
 0x725   :  { %636 = vadd.xlane.f32.xlu1 %v633_v3 }
 0x726   :  { %1179 = vmatpush3.bf16.msra.mxu1 %v1243_v46 }
 0x727   :  { %1180 = vmatprep.subr.bf16.mxu1 %v1373_v0 }
 0x72a   :  { %1181 = vmatpush3.bf16.msra.mxu1 %v1244_v47 }
 0x72b   :  { %1182 = vmatprep.subr.bf16.mxu1 %v1373_v0 }
 0x72e   :  { %1183 = vmatpush3.bf16.msra.mxu1 %v1245_v48 }
 0x72f   :  { %1184 = vmatprep.subr.bf16.mxu1 %v1373_v0 }
 0x732   :  { %1185 = vmatpush3.bf16.msra.mxu1 %v1246_v49 }
 0x733   :  { %1186 = vmatprep.subr.bf16.mxu1 %v1373_v0 }
 0x736   :  { %1187 = vmatpush3.bf16.msra.mxu1 %v1247_v50 }
 0x737   :  { %1188 = vmatprep.subr.bf16.mxu1 %v1373_v0 }
 0x73a   :  { %1189 = vmatpush3.bf16.msra.mxu1 %v1248_v51 }
 0x73b   :  { %1190 = vmatprep.subr.bf16.mxu1 %v1373_v0 }
 0x73e   :  { %1191 = vmatpush3.bf16.msra.mxu1 %v1249_v52 }
 0x73f   :  { %1196 = vmatprep.subr.bf16.mxu1 %v1373_v0 }
 0x7b2   :  { %v637_v5 = vpop.xlane.xlu1 %636 }
 0x7b3   :  { %v639_v6 = vmul.f32 0.0078125, %v637_v5 }
 0x7b5   :  { %v640_v7 = vsub.f32 %v633_v3, %v639_v6 }
 0x7b7   :  { %v641_v8 = vmul.f32 %v640_v7, %v640_v7 }
 0x7b9   :  { %642 = vadd.xlane.f32.xlu0 %v641_v8 }
 0x846   :  { %v643_v17 = vpop.xlane.xlu0 %642 }
 0x847   :  { %v644_v18 = vmul.f32 0.0078125, %v643_v17 }
 0x849   :  { %v645_v19 = vadd.f32 1e-05, %v644_v18 }
 0x84b   :  { %1262 = vrsqrt.f32 %v645_v19 }
 0x855   :  { %v1263_v20 = vpop.eup %1262 }
 0x856   :  { %v647_v22 = vmul.f32 %v1263_v20, %v640_v7 }
 0x858   :  { %v654_v24 = vmul.f32 %v1038_v21, %v647_v22 }
 0x85a   :  { %v661_v25 = vadd.f32 %v1039_v23, %v654_v24 }
 0x85c   :  { %v662_v26 = vmul.f32 %v661_v25, %v661_v25  ;;  %v663_v28 = vmul.f32 0.7978846, %v661_v25  ;;  %v667_v31 = vmul.f32 0.5, %v661_v25 }
 0x85e   :  { %v664_v27 = vmul.f32 0.044715, %v662_v26 }
 0x860   :  { %v665_v29 = vadd.f32 1.0, %v664_v27 }
 0x862   :  { %v666_v30 = vmul.f32 %v665_v29, %v663_v28 }
 0x864   :  { %1264 = vtanh.f32 %v666_v30 }
 0x865   :  { %1266 = vrcp.f32 %v979_v53 }
 0x86e   :  { %v1265_v4 = vpop.eup %1264 }
 0x86f   :  { %v669_v32 = vadd.f32 1.0, %v1265_v4  ;;  %v1267_v54 = vpop.eup %1266 }
 0x870   :  { %1207 = vpush %v1267_v54 }
 0x871   :  { %v670_v33 = vmul.f32 %v669_v32, %v667_v31 }
 0x873   :  { %v671_v34 = vpack.c.bf16 %v670_v33, %v670_v33 }
 0x875   :  { %1173 = vmatmul.mubr.bf16.vlgmr.msra.gmra.mrb[12].mxu0 %v671_v34 }
 0x8a1   :  { %s1208_s17 = spop %1207 }
 0x8a2   :  { %v982_v17 = vstv %s1208_s17 }
 0x948   :  { %v777_v36 = vpop.f32.mrb[12].mxu0 }
 0x949   :  { %v778_v37 = vadd.f32 %v1040_v35, %v777_v36  ;;  %v1174_v38 = vpop.f32.mrb[13].mxu0 }
 0x94a   :  { %v780_v39 = vpop.f32.mrb[14].mxu0 }
 0x94b   :  { %785 = vadd.xlane.f32.xlu1 %v778_v37  ;;  %v1175_v40 = vpop.f32.mrb[15].mxu0 }
 0x9d8   :  { %v786_v41 = vpop.xlane.xlu1 %785 }
 0x9d9   :  { %v787_v42 = vmul.f32 0.0078125, %v786_v41 }
 0x9db   :  { %v788_v43 = vsub.f32 %v778_v37, %v787_v42 }
 0x9dd   :  { %v789_v44 = vmul.f32 %v788_v43, %v788_v43 }
 0x9df   :  { %790 = vadd.xlane.f32.xlu0 %v789_v44 }
 0xa6c   :  { %v791_v55 = vpop.xlane.xlu0 %790 }
 0xa6d   :  { %v792_v56 = vmul.f32 0.0078125, %v791_v55 }
 0xa6f   :  { %v793_v57 = vadd.f32 1e-05, %v792_v56 }
 0xa71   :  { %1268 = vrsqrt.f32 %v793_v57 }
 0xa7b   :  { %v1269_v58 = vpop.eup %1268 }
 0xa7c   :  { %v795_v61 = vmul.f32 %v1269_v58, %v788_v43 }
 0xa7e   :  { %v802_v63 = vmul.f32 %v1049_v60, %v795_v61 }
 0xa80   :  { %v809_v1 = vadd.f32 %v1050_v62, %v802_v63 }
 0xa82   :  { %v810_v2 = vmul.f32 %v809_v1, %v809_v1  ;;  %v811_v5 = vmul.f32 0.7978846, %v809_v1  ;;  %v815_v9 = vmul.f32 0.5, %v809_v1 }
 0xa84   :  { %v812_v3 = vmul.f32 0.044715, %v810_v2 }
 0xa86   :  { %v813_v6 = vadd.f32 1.0, %v812_v3 }
 0xa88   :  { %v814_v7 = vmul.f32 %v813_v6, %v811_v5 }
 0xa8a   :  { %1270 = vtanh.f32 %v814_v7 }
 0xa94   :  { %v1271_v8 = vpop.eup %1270 }
 0xa95   :  { %v817_v10 = vadd.f32 1.0, %v1271_v8 }
 0xa97   :  { %v818_v12 = vmul.f32 %v817_v10, %v815_v9 }
 0xa99   :  { %v819_v13 = vpack.c.bf16 %v818_v12, %v818_v12 }
 0xa9b   :  { %1193 = vmatmul.mubr.bf16.vlgmr.msra.gmra.mrb[12].mxu1 %v819_v13 }
 0xa9c   :  { %1197 = vmatpush3.bf16.msra.mxu1 %v933_v14  ;;  %1198 = vmatprep.mubr.msk.bf16.mxu1 %vm1374_vm0, %v1373_v0 }
 0xaa7   :  { %1199 = vmatmul.mubr.msk.bf16.vlgmr.msra.gmra.mrb[12].mxu1 %vm436_vm5, %v1646_v59 }
 0xb7a   :  { %v969_v16 = vpop.f32.mrb[12].mxu1 }
 0xb7b   :  { %v1202_v18 = vadd.f32 %v1051_v15, %v969_v16  ;;  %v1200_v19 = vpop.f32.mrb[13].mxu1 }
 0xb7c   :  { %v972_v20 = vpop.f32.mrb[14].mxu1 }
 0xb7d   :  { %v983_v21 = vmul.f32 %v1202_v18, %v982_v17  ;;  %v1201_v22 = vpop.f32.mrb[15].mxu1 }
 0xb7f   :  { %v984_v23 = vsel %vm436_vm5, %v983_v21, -inf }
 0xb80   :  { %985 = vmax.xlane.f32.xlu1 %v984_v23 }
 0xc0d   :  { %v986_v24 = vpop.xlane.xlu1 %985 }
 0xc0e   :  { %v987_v0 = vsub.f32 %v983_v21, %v986_v24 }
 0xc10   :  { %v988_v25 = vmul.f32 1.442695, %v987_v0 }
 0xc12   :  { %1272 = vpow2.f32 %v988_v25 }
 0xc1c   :  { %v1273_v59 = vpop.eup %1272 }
 0xc1d   :  { %v990_v26 = vsel %vm436_vm5, %v1273_v59, 0.0 }
 0xc1e   :  { %991 = vadd.xlane.f32.xlu0 %v990_v26 }
 0xcab   :  { %v992_v27 = vpop.xlane.xlu0 %991 }
 0xcac   :  { %1274 = vrcp.f32 %v992_v27 }
 0xcb6   :  { %v1275_v28 = vpop.eup %1274 }
 0xcb7   :  { %v994_v29 = vmul.f32 %v1275_v28, %v1273_v59 }
 0xcb9   :  { %995 = vst.msk [vmem:[#allocation9] sm:$0xff] %vm436_vm5, %v994_v29 }
 0xcba   :  { %1353 = shalt.err (!%p1350_p0)
}
 0xcbb   :  { %s1354_s26 = scalar_lea.hbm %s1785_s23, 128 }
 0xcbc   :  { %p1355_p1 = scmp.ne.s32.totalorder %s1785_s23, %s1354_s26  ;;  %p1358_p2 = scmp.lt.u32.totalorder %s1354_s26, %s1785_s23 }
 0xcbe   :  { %p1360_p3 = pnand %p1358_p2, %p1355_p1 }
 0xcc0   :  { %1363 = shalt.err (!%p1360_p3)
}
 0xcc1   :  { %1005 = dma.vmem_to_hbm [thread:$0]  %s1003_s21, 128, %s1785_s23, [#allocation5]  }
 0xcc2   :  { %1368 = dma.done.wait [#allocation5], 128  }
 0xcc3   :  { %1369 = vsyncadd [#allocation5], 4294967168 }
 0xcc4   :  { %1009 = vsyncpa [#allocation4], 1 }
 0xcc5   :  { %1010 = vsyncpa [#allocation7], 1 }
 0xcc6   :  { %1011 = vsyncpa [#allocation5], 1 }

</bundles_post_ra>
